<compile_context>
chip_gen: v7x
topology: tpu7x:2x2x1
jax: 0.10.0
libtpu: 0.0.40
codegen_flags: <defaults>
</compile_context>

<pallas_src>
import functools

import jax
import jax.numpy as jnp
from jax.experimental import pallas as pl
from jax.experimental.pallas import tpu as pltpu

LANE = 128


def _round_up(x, m):
    return ((x + m - 1) // m) * m


def qnet_kernel(obs_ref, w1_ref, b1_ref, w2_ref, b2_ref,
                w3_ref, b3_ref, w4_ref, b4_ref, out_ref):
    # 4 MXU matmuls (bf16 in, f32 accumulate) + VPU bias/ReLU, fully fused.
    x = obs_ref[...].astype(jnp.bfloat16)

    h1 = jnp.dot(x, w1_ref[...], preferred_element_type=jnp.float32) + b1_ref[...]
    h1 = jnp.maximum(h1, 0.0).astype(jnp.bfloat16)

    h2 = jnp.dot(h1, w2_ref[...], preferred_element_type=jnp.float32) + b2_ref[...]
    h2 = jnp.maximum(h2, 0.0).astype(jnp.bfloat16)

    h3 = jnp.dot(h2, w3_ref[...], preferred_element_type=jnp.float32) + b3_ref[...]
    h3 = jnp.maximum(h3, 0.0).astype(jnp.bfloat16)

    h4 = jnp.dot(h3, w4_ref[...], preferred_element_type=jnp.float32) + b4_ref[...]
    out_ref[...] = h4.astype(out_ref.dtype)   # lane-dense (TM, 128) store


@functools.partial(jax.jit, static_argnames=("tile_m",))
def qnet_forward(obs, params, *, tile_m=512):
    """obs: (B, dim_obs) float32. params: dict of f32 weights/biases."""
    B, dim_obs = obs.shape
    num_act = params["w4"].shape[1]
    num_act_pad = max(LANE, _round_up(num_act, LANE))

    # Batch tile: multiple of 8 sublanes, capped at 512 (portable to v7x VMEM).
    tm = min(tile_m, max(8, _round_up(B, 8)))
    b_pad = _round_up(B, tm)
    if b_pad != B:
        obs = jnp.pad(obs, ((0, b_pad - B), (0, 0)))

    # bf16 weights (halves weight DMA + vreg footprint), f32 biases.
    w1 = params["w1"].astype(jnp.bfloat16)
    w2 = params["w2"].astype(jnp.bfloat16)
    w3 = params["w3"].astype(jnp.bfloat16)
    b1 = params["b1"].astype(jnp.float32)
    b2 = params["b2"].astype(jnp.float32)
    b3 = params["b3"].astype(jnp.float32)
    # Pad final layer to 128 output lanes for an unmasked vst store.
    w4 = jnp.pad(params["w4"], ((0, 0), (0, num_act_pad - num_act))
                 ).astype(jnp.bfloat16)
    b4 = jnp.pad(params["b4"], ((0, 0), (0, num_act_pad - num_act))
                 ).astype(jnp.float32)

    d1, d2, d3 = w1.shape[1], w2.shape[1], w3.shape[1]   # 256, 128, 64
    grid = (b_pad // tm,)
    const = lambda i: (0, 0)   # weights/biases: same block every step -> stay resident

    flops = 2 * b_pad * (dim_obs * d1 + d1 * d2 + d2 * d3 + d3 * num_act_pad)
    bytes_accessed = (
        b_pad * dim_obs * 4                              # obs (f32)
        + 2 * (dim_obs * d1 + d1 * d2 + d2 * d3 + d3 * num_act_pad)  # bf16 weights
        + 4 * (d1 + d2 + d3 + num_act_pad)               # f32 biases
        + b_pad * num_act_pad * 4                        # output (f32)
    )

    out = pl.pallas_call(
        qnet_kernel,
        out_shape=jax.ShapeDtypeStruct((b_pad, num_act_pad), jnp.float32),
        grid=grid,
        in_specs=[
            pl.BlockSpec((tm, dim_obs), lambda i: (i, 0)),       # obs tile
            pl.BlockSpec((dim_obs, d1), const),                  # w1
            pl.BlockSpec((1, d1), const),                        # b1
            pl.BlockSpec((d1, d2), const),                       # w2
            pl.BlockSpec((1, d2), const),                        # b2
            pl.BlockSpec((d2, d3), const),                       # w3
            pl.BlockSpec((1, d3), const),                        # b3
            pl.BlockSpec((d3, num_act_pad), const),              # w4 (padded)
            pl.BlockSpec((1, num_act_pad), const),               # b4 (padded)
        ],
        out_specs=pl.BlockSpec((tm, num_act_pad), lambda i: (i, 0)),
        compiler_params=pltpu.CompilerParams(
            dimension_semantics=("parallel",)),                  # 2 TCs on v7x
        cost_estimate=pl.CostEstimate(
            flops=flops, transcendentals=0, bytes_accessed=bytes_accessed),
    )(obs, w1, b1, w2, b2, w3, b3, w4, b4)

    return out[:B, :num_act]


def init_qnet_params(key, dim_obs, num_act):
    """Deterministic init mimicking PyTorch nn.Linear default U(-1/sqrt(fan_in), +)."""
    dims = [dim_obs, 256, 128, 64, num_act]
    params = {}
    for i in range(4):
        fan_in, fan_out = dims[i], dims[i + 1]
        key, kw, kb = jax.random.split(key, 3)
        bound = 1.0 / jnp.sqrt(jnp.float32(fan_in))
        params[f"w{i+1}"] = jax.random.uniform(
            kw, (fan_in, fan_out), jnp.float32, -bound, bound)
        params[f"b{i+1}"] = jax.random.uniform(
            kb, (1, fan_out), jnp.float32, -bound, bound)
    return params


def qnet_reference(obs, params):
    """Pure-JAX f32 reference for correctness check."""
    x = jnp.maximum(obs @ params["w1"] + params["b1"], 0.0)
    x = jnp.maximum(x @ params["w2"] + params["b2"], 0.0)
    x = jnp.maximum(x @ params["w3"] + params["b3"], 0.0)
    return x @ params["w4"] + params["b4"]


if __name__ == "__main__":
    B, dim_obs, num_act = 8, 32, 8

    key = jax.random.PRNGKey(0)
    key, k_obs = jax.random.split(key)
    obs = jax.random.normal(k_obs, (B, dim_obs), jnp.float32)
    params = init_qnet_params(key, dim_obs, num_act)

    out = qnet_forward(obs, params)
    out = jax.block_until_ready(out)

    ref = qnet_reference(obs, params)
    assert out.shape == (B, num_act)
    # bf16 weights/activations (f32 accumulation) -> looser tolerance vs f32 ref.
    assert jnp.allclose(out, ref, atol=2e-2, rtol=2e-2)

    print("KERNEL_OK")
</pallas_src>

<mosaic_0001>
module attributes {stable_mosaic.version = 11 : i64} {
  func.func @qnet_kernel(%arg0: i32, %arg1: memref<8x32xf32, #tpu.memory_space<vmem>>, %arg2: memref<32x256xbf16, #tpu.memory_space<vmem>>, %arg3: memref<1x256xf32, #tpu.memory_space<vmem>>, %arg4: memref<256x128xbf16, #tpu.memory_space<vmem>>, %arg5: memref<1x128xf32, #tpu.memory_space<vmem>>, %arg6: memref<128x64xbf16, #tpu.memory_space<vmem>>, %arg7: memref<1x64xf32, #tpu.memory_space<vmem>>, %arg8: memref<64x128xbf16, #tpu.memory_space<vmem>>, %arg9: memref<1x128xf32, #tpu.memory_space<vmem>>, %arg10: memref<8x128xf32, #tpu.memory_space<vmem>>) attributes {dimension_semantics = [#tpu.dimension_semantics<parallel>], iteration_bounds = array<i64: 1>, scalar_prefetch = 0 : i64, scratch_operands = 0 : i64, tpu.core_type = #tpu.core_type<tc>, window_params = [{transform_indices = @transform_0, window_bounds = array<i64: 8, 32>}, {pipeline_mode = #tpu.pipeline_mode<synchronous>, transform_indices = @transform_1, window_bounds = array<i64: 32, 256>}, {pipeline_mode = #tpu.pipeline_mode<synchronous>, transform_indices = @transform_2, window_bounds = array<i64: 1, 256>}, {pipeline_mode = #tpu.pipeline_mode<synchronous>, transform_indices = @transform_3, window_bounds = array<i64: 256, 128>}, {pipeline_mode = #tpu.pipeline_mode<synchronous>, transform_indices = @transform_4, window_bounds = array<i64: 1, 128>}, {pipeline_mode = #tpu.pipeline_mode<synchronous>, transform_indices = @transform_5, window_bounds = array<i64: 128, 64>}, {pipeline_mode = #tpu.pipeline_mode<synchronous>, transform_indices = @transform_6, window_bounds = array<i64: 1, 64>}, {pipeline_mode = #tpu.pipeline_mode<synchronous>, transform_indices = @transform_7, window_bounds = array<i64: 64, 128>}, {pipeline_mode = #tpu.pipeline_mode<synchronous>, transform_indices = @transform_8, window_bounds = array<i64: 1, 128>}, {transform_indices = @transform_9, window_bounds = array<i64: 8, 128>}]} {
    %c0 = arith.constant 0 : index
    %c0_0 = arith.constant 0 : index
    %0 = vector.load %arg1[%c0, %c0_0] : memref<8x32xf32, #tpu.memory_space<vmem>>, vector<8x32xf32>
    %1 = arith.truncf %0 : vector<8x32xf32> to vector<8x32xbf16>
    %c0_1 = arith.constant 0 : index
    %c0_2 = arith.constant 0 : index
    %2 = vector.load %arg2[%c0_1, %c0_2] : memref<32x256xbf16, #tpu.memory_space<vmem>>, vector<32x256xbf16>
    %cst = arith.constant dense<0.000000e+00> : vector<8x256xf32>
    %3 = tpu.matmul %1, %2, %cst {dimension_numbers = #tpu.dot_dimension_numbers<[1], [0], [0], [1], [0, 0, 1, 1], [], []>} : vector<8x32xbf16>, vector<32x256xbf16>, vector<8x256xf32> -> vector<8x256xf32>
    %c0_3 = arith.constant 0 : index
    %c0_4 = arith.constant 0 : index
    %4 = vector.load %arg3[%c0_3, %c0_4] : memref<1x256xf32, #tpu.memory_space<vmem>>, vector<1x256xf32>
    %5 = vector.broadcast %4 : vector<1x256xf32> to vector<8x256xf32>
    %6 = arith.addf %3, %5 : vector<8x256xf32>
    %cst_5 = arith.constant 0.000000e+00 : f32
    %7 = vector.broadcast %cst_5 : f32 to vector<8x256xf32>
    %8 = arith.maximumf %6, %7 : vector<8x256xf32>
    %9 = arith.truncf %8 : vector<8x256xf32> to vector<8x256xbf16>
    %c0_6 = arith.constant 0 : index
    %c0_7 = arith.constant 0 : index
    %10 = vector.load %arg4[%c0_6, %c0_7] : memref<256x128xbf16, #tpu.memory_space<vmem>>, vector<256x128xbf16>
    %cst_8 = arith.constant dense<0.000000e+00> : vector<8x128xf32>
    %11 = tpu.matmul %9, %10, %cst_8 {dimension_numbers = #tpu.dot_dimension_numbers<[1], [0], [0], [1], [0, 0, 1, 1], [], []>} : vector<8x256xbf16>, vector<256x128xbf16>, vector<8x128xf32> -> vector<8x128xf32>
    %c0_9 = arith.constant 0 : index
    %c0_10 = arith.constant 0 : index
    %12 = vector.load %arg5[%c0_9, %c0_10] : memref<1x128xf32, #tpu.memory_space<vmem>>, vector<1x128xf32>
    %13 = vector.broadcast %12 : vector<1x128xf32> to vector<8x128xf32>
    %14 = arith.addf %11, %13 : vector<8x128xf32>
    %cst_11 = arith.constant 0.000000e+00 : f32
    %15 = vector.broadcast %cst_11 : f32 to vector<8x128xf32>
    %16 = arith.maximumf %14, %15 : vector<8x128xf32>
    %17 = arith.truncf %16 : vector<8x128xf32> to vector<8x128xbf16>
    %c0_12 = arith.constant 0 : index
    %c0_13 = arith.constant 0 : index
    %18 = vector.load %arg6[%c0_12, %c0_13] : memref<128x64xbf16, #tpu.memory_space<vmem>>, vector<128x64xbf16>
    %cst_14 = arith.constant dense<0.000000e+00> : vector<8x64xf32>
    %19 = tpu.matmul %17, %18, %cst_14 {dimension_numbers = #tpu.dot_dimension_numbers<[1], [0], [0], [1], [0, 0, 1, 1], [], []>} : vector<8x128xbf16>, vector<128x64xbf16>, vector<8x64xf32> -> vector<8x64xf32>
    %c0_15 = arith.constant 0 : index
    %c0_16 = arith.constant 0 : index
    %20 = vector.load %arg7[%c0_15, %c0_16] : memref<1x64xf32, #tpu.memory_space<vmem>>, vector<1x64xf32>
    %21 = vector.broadcast %20 : vector<1x64xf32> to vector<8x64xf32>
    %22 = arith.addf %19, %21 : vector<8x64xf32>
    %cst_17 = arith.constant 0.000000e+00 : f32
    %23 = vector.broadcast %cst_17 : f32 to vector<8x64xf32>
    %24 = arith.maximumf %22, %23 : vector<8x64xf32>
    %25 = arith.truncf %24 : vector<8x64xf32> to vector<8x64xbf16>
    %c0_18 = arith.constant 0 : index
    %c0_19 = arith.constant 0 : index
    %26 = vector.load %arg8[%c0_18, %c0_19] : memref<64x128xbf16, #tpu.memory_space<vmem>>, vector<64x128xbf16>
    %cst_20 = arith.constant dense<0.000000e+00> : vector<8x128xf32>
    %27 = tpu.matmul %25, %26, %cst_20 {dimension_numbers = #tpu.dot_dimension_numbers<[1], [0], [0], [1], [0, 0, 1, 1], [], []>} : vector<8x64xbf16>, vector<64x128xbf16>, vector<8x128xf32> -> vector<8x128xf32>
    %c0_21 = arith.constant 0 : index
    %c0_22 = arith.constant 0 : index
    %28 = vector.load %arg9[%c0_21, %c0_22] : memref<1x128xf32, #tpu.memory_space<vmem>>, vector<1x128xf32>
    %29 = vector.broadcast %28 : vector<1x128xf32> to vector<8x128xf32>
    %30 = arith.addf %27, %29 : vector<8x128xf32>
    %c0_23 = arith.constant 0 : index
    %c0_24 = arith.constant 0 : index
    %31 = vector.load %arg10[%c0_23, %c0_24] : memref<8x128xf32, #tpu.memory_space<vmem>>, vector<8x128xf32>
    tpu.vector_store %arg10[%c0_23, %c0_24], %30 {strides = array<i32>} : memref<8x128xf32, #tpu.memory_space<vmem>>, vector<8x128xf32>,
    return
  }
  func.func @transform_0(%arg0: i32) -> (i32, i32) {
    %c0_i32 = arith.constant 0 : i32
    %c0_i32_0 = arith.constant 0 : i32
    return %arg0, %c0_i32 : i32, i32
  }
  func.func @transform_1(%arg0: i32) -> (i32, i32) {
    %c0_i32 = arith.constant 0 : i32
    %c0_i32_0 = arith.constant 0 : i32
    %c0_i32_1 = arith.constant 0 : i32
    return %c0_i32, %c0_i32_0 : i32, i32
  }
  func.func @transform_2(%arg0: i32) -> (i32, i32) {
    %c0_i32 = arith.constant 0 : i32
    %c0_i32_0 = arith.constant 0 : i32
    %c0_i32_1 = arith.constant 0 : i32
    return %c0_i32, %c0_i32_0 : i32, i32
  }
  func.func @transform_3(%arg0: i32) -> (i32, i32) {
    %c0_i32 = arith.constant 0 : i32
    %c0_i32_0 = arith.constant 0 : i32
    %c0_i32_1 = arith.constant 0 : i32
    return %c0_i32, %c0_i32_0 : i32, i32
  }
  func.func @transform_4(%arg0: i32) -> (i32, i32) {
    %c0_i32 = arith.constant 0 : i32
    %c0_i32_0 = arith.constant 0 : i32
    %c0_i32_1 = arith.constant 0 : i32
    return %c0_i32, %c0_i32_0 : i32, i32
  }
  func.func @transform_5(%arg0: i32) -> (i32, i32) {
    %c0_i32 = arith.constant 0 : i32
    %c0_i32_0 = arith.constant 0 : i32
    %c0_i32_1 = arith.constant 0 : i32
    return %c0_i32, %c0_i32_0 : i32, i32
  }
  func.func @transform_6(%arg0: i32) -> (i32, i32) {
    %c0_i32 = arith.constant 0 : i32
    %c0_i32_0 = arith.constant 0 : i32
    %c0_i32_1 = arith.constant 0 : i32
    return %c0_i32, %c0_i32_0 : i32, i32
  }
  func.func @transform_7(%arg0: i32) -> (i32, i32) {
    %c0_i32 = arith.constant 0 : i32
    %c0_i32_0 = arith.constant 0 : i32
    %c0_i32_1 = arith.constant 0 : i32
    return %c0_i32, %c0_i32_0 : i32, i32
  }
  func.func @transform_8(%arg0: i32) -> (i32, i32) {
    %c0_i32 = arith.constant 0 : i32
    %c0_i32_0 = arith.constant 0 : i32
    %c0_i32_1 = arith.constant 0 : i32
    return %c0_i32, %c0_i32_0 : i32, i32
  }
  func.func @transform_9(%arg0: i32) -> (i32, i32) {
    %c0_i32 = arith.constant 0 : i32
    %c0_i32_0 = arith.constant 0 : i32
    return %arg0, %c0_i32 : i32, i32
  }
}

</mosaic_0001>

<bundles_post_ra>
// kernel: qnet_forward.1
= control target key start
LH: loop header
LB: loop body
LE: loop exit
PB: predicated region body
PF: predicated region fallthrough
CT: control target
= control target key end

     0   :  { %v676_v2 = vmov 0   ;;  %vm72_vm0 = vcmask 261120   ;;  %s867_s0 = inlined_call_operand.vmem [shape: f32[8,32], index: 0, kind: input, shape index: {}]   ;;  %s868_s1 = inlined_call_operand.vmem [shape: bf16[32,256], index: 1, kind: input, shape index: {}]   ;;  %s869_s2 = inlined_call_operand.vmem [shape: f32[1,256], index: 2, kind: input, shape index: {}]   ;;  %s870_s3 = inlined_call_operand.vmem [shape: bf16[256,128], index: 3, kind: input, shape index: {}]   ;;  %s871_s4 = inlined_call_operand.vmem [shape: f32[1,128], index: 4, kind: input, shape index: {}]   ;;  %s872_s5 = inlined_call_operand.vmem [shape: bf16[128,64], index: 5, kind: input, shape index: {}]   ;;  %s873_s6 = inlined_call_operand.vmem [shape: f32[1,64], index: 6, kind: input, shape index: {}]   ;;  %s874_s7 = inlined_call_operand.vmem [shape: bf16[64,128], index: 7, kind: input, shape index: {}]   ;;  %s875_s8 = inlined_call_operand.vmem [shape: f32[1,128], index: 8, kind: input, shape index: {}]   ;;  %s876_s9 = inlined_call_operand.hbm [shape: f32[8,128], index: 9, kind: output, shape index: {}]  }
   0x1   :  { %v618_v0 = vld [vmem:[%s868_s1 + $0x4] ss:$8 sps:$4 sm:$0xff]   ;;  %v620_v1 = vld [vmem:[%s868_s1] ss:$8 sps:$4 sm:$0xff]   ;;  %108 = vmatprep.mubr.bf16.mxu0 %v676_v2  ;;  %v621_v3 = vld [vmem:[%s868_s1 + $0x14] ss:$8 sps:$4 sm:$0xff]  }
   0x2   :  { %76 = vmatprep.subr.bf16.mxu0 %v618_v0  ;;  %v623_v4 = vld [vmem:[%s868_s1 + $0x10] ss:$8 sps:$4 sm:$0xff]   ;;  %v34_v5 = vld [vmem:[%s867_s0] sm:$0xff]  ;;  %v626_v8 = vld [vmem:[%s870_s3 + $0x48] sm:$0xff]  }
   0x3   :  { %77 = vmatpush1.bf16.msra.mxu0 %v620_v1  ;;  %v624_v6 = vld [vmem:[%s870_s3 + $0x40] sm:$0xff]   ;;  %v35_v9 = vpack.c.bf16 %v34_v5, %v34_v5  ;;  %v627_v10 = vld [vmem:[%s870_s3 + $0x8] sm:$0xff]   ;;  %v628_v11 = vld [vmem:[%s870_s3 + $0x50] sm:$0xff]  }
   0x4   :  { %78 = vmatprep.subr.bf16.mxu0 %v621_v3  ;;  %v625_v7 = vld [vmem:[%s870_s3] sm:$0xff]   ;;  %546 = vmatprep.subr.bf16.mxu1 %v624_v6  ;;  %v629_v12 = vld [vmem:[%s870_s3 + $0x10] sm:$0xff]   ;;  %v630_v13 = vld [vmem:[%s870_s3 + $0x58] sm:$0xff]  }
   0x5   :  { %547 = vmatpush3.bf16.msra.mxu1 %v625_v7  ;;  %v631_v14 = vld [vmem:[%s870_s3 + $0x18] sm:$0xff]   ;;  %v632_v15 = vld [vmem:[%s870_s3 + $0x60] sm:$0xff]   ;;  %v634_v17 = vld [vmem:[%s870_s3 + $0x68] sm:$0xff]  }
   0x6   :  { %548 = vmatprep.subr.bf16.mxu1 %v626_v8  ;;  %v633_v16 = vld [vmem:[%s870_s3 + $0x20] sm:$0xff]   ;;  %v635_v18 = vld [vmem:[%s870_s3 + $0x28] sm:$0xff]  }
   0x7   :  { %79 = vmatpush1.bf16.msra.mxu0 %v623_v4 }
   0x9   :  { %549 = vmatpush3.bf16.msra.mxu1 %v627_v10 }
   0xa   :  { %513 = vmatmul.mubr.msk.bf16.vlgmr.msra.gmra.mrb[0].mxu0 %vm72_vm0, %v35_v9  ;;  %550 = vmatprep.subr.bf16.mxu1 %v628_v11 }
   0xd   :  { %551 = vmatpush3.bf16.msra.mxu1 %v629_v12 }
   0xe   :  { %552 = vmatprep.subr.bf16.mxu1 %v630_v13 }
  0x11   :  { %553 = vmatpush3.bf16.msra.mxu1 %v631_v14 }
  0x12   :  { %554 = vmatprep.subr.bf16.mxu1 %v632_v15 }
  0x15   :  { %555 = vmatpush3.bf16.msra.mxu1 %v633_v16 }
  0x16   :  { %556 = vmatprep.subr.bf16.mxu1 %v634_v17 }
  0x19   :  { %557 = vmatpush3.bf16.msra.mxu1 %v635_v18 }
  0x1a   :  { %14 = vsyncpa [#allocation3], 0  ;;  %v636_v19 = vld [vmem:[%s870_s3 + $0x70] sm:$0xff]   ;;  %v638_v21 = vld [vmem:[%s870_s3 + $0x78] sm:$0xff]   ;;  %v677_v24 = vmov 0.0   ;;  %v42_v30 = vlaneseq  ;;  %vm678_vm1 = vmmov 0  }
  0x1b   :  { %v637_v20 = vld [vmem:[%s870_s3 + $0x30] sm:$0xff]   ;;  %558 = vmatprep.subr.bf16.mxu1 %v636_v19  ;;  %v639_v22 = vld [vmem:[%s870_s3 + $0x38] sm:$0xff]   ;;  %v640_v23 = vld [vmem:[%s872_s5] sm:$0xff]   ;;  %582 = vmatprep.subr.bf16.mxu0 %v677_v24  ;;  %vm450_vm2 = vcmask 523264   ;;  %s679_s30 = smov [#allocation2]  }
  0x1c   :  { %583 = vmatpush3.bf16.msra.mxu0 %v640_v23  ;;  %v641_v25 = vld [vmem:[%s872_s5 + $0x8] sm:$0xff]   ;;  %v642_v26 = vld [vmem:[%s872_s5 + $0x10] sm:$0xff]   ;;  %v643_v27 = vld [vmem:[%s872_s5 + $0x18] sm:$0xff]   ;;  %v43_v31 = vshrl.u32 %v42_v30, 7  ;;  %598 = vmatprep.mubr.msk.bf16.mxu0 %vm678_vm1, %v677_v24 }
  0x1d   :  { %559 = vmatpush3.bf16.msra.mxu1 %v637_v20  ;;  %584 = vmatprep.subr.bf16.mxu0 %v677_v24  ;;  %v644_v28 = vld [vmem:[%s872_s5 + $0x20] sm:$0xff]   ;;  %v645_v29 = vld [vmem:[%s872_s5 + $0x28] sm:$0xff]   ;;  %v646_v47 = vld [vmem:[%s872_s5 + $0x30] sm:$0xff]  }
  0x1e   :  { %560 = vmatprep.subr.bf16.mxu1 %v638_v21  ;;  %v44_v32 = vsub.s32 0, %v43_v31  ;;  %v40_v33 = vld [vmem:[%s869_s2] sm:$0x3]  ;;  %v48_v34 = vsub.s32 1, %v43_v31  ;;  %v647_v48 = vld [vmem:[%s872_s5 + $0x38] sm:$0xff]   ;;  %v649_v50 = vld [vmem:[%s874_s7 + $0x8] sm:$0xff]  }
  0x1f   :  { %v648_v49 = vld [vmem:[%s874_s7] sm:$0xff]   ;;  %v650_v60 = vld [vmem:[%s874_s7 + $0x10] sm:$0xff]   ;;  %v651_v61 = vld [vmem:[%s874_s7 + $0x18] sm:$0xff]   ;;  %s501_s7 = sshll.u32 %s679_s30, 4  ;;  %s502_s7 = int_to_ptr.vmem [resolvable:$true] %s501_s7 }
  0x20   :  { %585 = vmatpush3.bf16.msra.mxu0 %v641_v25  ;;  %v45_v35 = vrot.slane %v40_v33, %v44_v32  ;;  %v49_v36 = vrot.slane %v40_v33, %v48_v34  ;;  %v514_v52 = vld [vmem:[%s871_s4] ss:$0 sm:$0xff]  ;;  %p657_p1 = scmp.lt.s32.totalorder %s502_s7, %s502_s7 }
  0x21   :  { %561 = vmatpush3.bf16.msra.mxu1 %v639_v22  ;;  %586 = vmatprep.subr.bf16.mxu0 %v677_v24  ;;  %v531_v62 = vld [vmem:[%s873_s6] ss:$0 sm:$0xff]  ;;  %s652_s6 = scalar_lea.vmem %s502_s7, 128 }
  0x22   :  { %602 = vmatprep.subr.bf16.mxu1 %v677_v24  ;;  %v540_v6 = vld [vmem:[%s875_s8] ss:$0 sm:$0xff]  ;;  %p653_p0 = scmp.ne.s32.totalorder %s502_s7, %s652_s6  ;;  %p658_p2 = scmp.lt.s32.totalorder %s652_s6, %s652_s6 }
  0x24   :  { %587 = vmatpush3.bf16.msra.mxu0 %v642_v26  ;;  %p659_p3 = por %p658_p2, %p657_p1 }
  0x25   :  { %588 = vmatprep.subr.bf16.mxu0 %v677_v24 }
  0x26   :  { %p660_p4 = pnand %p659_p3, %p653_p0 }
  0x28   :  { %589 = vmatpush3.bf16.msra.mxu0 %v643_v27 }
  0x29   :  { %590 = vmatprep.subr.bf16.mxu0 %v677_v24 }
  0x2c   :  { %591 = vmatpush3.bf16.msra.mxu0 %v644_v28 }
  0x2d   :  { %592 = vmatprep.subr.bf16.mxu0 %v677_v24 }
  0x30   :  { %593 = vmatpush3.bf16.msra.mxu0 %v645_v29 }
  0x31   :  { %594 = vmatprep.subr.bf16.mxu0 %v677_v24 }
  0x34   :  { %595 = vmatpush3.bf16.msra.mxu0 %v646_v47 }
  0x35   :  { %596 = vmatprep.subr.bf16.mxu0 %v677_v24 }
  0x38   :  { %597 = vmatpush3.bf16.msra.mxu0 %v647_v48 }
  0xdd   :  { %v110_v37 = vpop.f32.mrb[0].mxu0 }
  0xde   :  { %v111_v38 = vadd.f32 %v110_v37, %v45_v35  ;;  %v112_v39 = vpop.f32.mrb[1].mxu0 }
  0xdf   :  { %v113_v40 = vadd.f32 %v112_v39, %v49_v36  ;;  %v114_v41 = vpop.f32.mrb[2].mxu0 }
  0xe0   :  { %v117_v42 = vmax.f32 %v111_v38, 0.0  ;;  %v115_v43 = vpop.f32.mrb[3].mxu0 }
  0xe1   :  { %v118_v44 = vmax.f32 %v113_v40, 0.0 }
  0xe2   :  { %v119_v46 = vpack.c.bf16 %v117_v42, %v117_v42 }
  0xe3   :  { %v120_v45 = vpack.c.bf16 %v118_v44, %v118_v44 }
  0xe5   :  { %288 = vmatprep.mubr.bf16.mxu1 %v120_v45 }
  0xe6   :  { %289 = vmatmul.mubr.bf16.vlgmr.msra.gmra.mrb[0].mxu1 %v119_v46 }
  0xe7   :  { %610 = vmatprep.mubr.msk.bf16.mxu1 %vm678_vm1, %v677_v24  ;;  %603 = vmatpush3.bf16.msra.mxu1 %v648_v49 }
  0xe8   :  { %604 = vmatprep.subr.bf16.mxu1 %v677_v24 }
  0xeb   :  { %605 = vmatpush3.bf16.msra.mxu1 %v649_v50 }
  0xec   :  { %606 = vmatprep.subr.bf16.mxu1 %v677_v24 }
  0xef   :  { %607 = vmatpush3.bf16.msra.mxu1 %v650_v60 }
  0xf0   :  { %608 = vmatprep.subr.bf16.mxu1 %v677_v24 }
  0xf3   :  { %609 = vmatpush3.bf16.msra.mxu1 %v651_v61 }
 0x1b9   :  { %v562_v51 = vpop.f32.mrb[0].mxu1 }
 0x1ba   :  { %v563_v53 = vpop.f32.mrb[1].mxu1 }
 0x1bb   :  { %v564_v54 = vadd.f32 %v563_v53, %v562_v51  ;;  %v565_v55 = vpop.f32.mrb[2].mxu1 }
 0x1bc   :  { %v566_v56 = vpop.f32.mrb[3].mxu1 }
 0x1bd   :  { %v291_v57 = vadd.f32 %v564_v54, %v514_v52 }
 0x1bf   :  { %v296_v58 = vmax.f32 %v291_v57, 0.0 }
 0x1c1   :  { %v297_v59 = vpack.c.bf16 %v296_v58, %v296_v58 }
 0x1c3   :  { %599 = vmatmul.mubr.bf16.vlgmr.msra.gmra.mrb[4].mxu0 %v297_v59 }
 0x296   :  { %v403_v63 = vpop.f32.mrb[4].mxu0 }
 0x297   :  { %v404_v0 = vadd.f32 %v531_v62, %v403_v63  ;;  %v600_v1 = vpop.f32.mrb[5].mxu0 }
 0x298   :  { %v406_v2 = vpop.f32.mrb[6].mxu0 }
 0x299   :  { %v409_v3 = vmax.f32 %v404_v0, 0.0  ;;  %v601_v4 = vpop.f32.mrb[7].mxu0 }
 0x29b   :  { %v410_v5 = vpack.c.bf16 %v409_v3, %v409_v3 }
 0x29d   :  { %611 = vmatmul.mubr.msk.bf16.vlgmr.msra.gmra.mrb[4].mxu1 %vm450_vm2, %v410_v5 }
 0x370   :  { %v488_v7 = vpop.f32.mrb[4].mxu1 }
 0x371   :  { %v489_v8 = vadd.f32 %v540_v6, %v488_v7  ;;  %v612_v9 = vpop.f32.mrb[5].mxu1 }
 0x372   :  { %v491_v10 = vpop.f32.mrb[6].mxu1 }
 0x373   :  { %494 = vst [vmem:[#allocation2] sm:$0xff] %v489_v8  ;;  %v613_v11 = vpop.f32.mrb[7].mxu1 }
 0x374   :  { %663 = shalt.err (!%p660_p4)
}
 0x375   :  { %s664_s8 = scalar_lea.hbm %s876_s9, 128 }
 0x376   :  { %p665_p5 = scmp.ne.s32.totalorder %s876_s9, %s664_s8  ;;  %p668_p6 = scmp.lt.u32.totalorder %s664_s8, %s876_s9 }
 0x378   :  { %p670_p7 = pnand %p668_p6, %p665_p5 }
 0x37a   :  { %673 = shalt.err (!%p670_p7)
}
 0x37b   :  { %504 = dma.vmem_to_hbm [thread:$0]  %s502_s7, 128, %s876_s9, [#allocation3]  }
 0x37c   :  { %674 = dma.done.wait [#allocation3], 128  }
 0x37d   :  { %675 = vsyncadd [#allocation3], 4294967168 }
 0x37e   :  { %508 = vsyncpa [#allocation3], 1 }

</bundles_post_ra>
